<compile_context>
chip_gen: v7x
topology: tpu7x:2x2x1
jax: 0.10.0
libtpu: 0.0.40
codegen_flags: <defaults>
</compile_context>

<pallas_src>
from functools import partial

import jax
import jax.numpy as jnp
from jax import lax
from jax.experimental import pallas as pl
from jax.experimental.pallas import tpu as pltpu

EPS = 1e-5
LANES = 128


def _bn_relu_kernel(x_ref, g_ref, b_ref, o_ref):
    # x_ref : (B, ts, 128)  dense slab of the flattened feature matrix
    # g_ref : (ts, 128)     gamma tile (f32) for this grid step
    # b_ref : (ts, 128)     beta  tile (f32) for this grid step
    # o_ref : (B, ts, 128)
    x = x_ref[...].astype(jnp.float32)
    inv_n = jnp.float32(1.0 / x.shape[0])

    mean = jnp.sum(x, axis=0, keepdims=True) * inv_n        # (1, ts, 128)
    xm = x - mean                                           # centered, reused
    var = jnp.sum(xm * xm, axis=0, keepdims=True) * inv_n   # biased (1/N) var
    inv_std = lax.rsqrt(var + EPS)

    g = g_ref[...][None]                                    # (1, ts, 128)
    b = b_ref[...][None]

    y = xm * (inv_std * g) + b
    o_ref[...] = jnp.maximum(y, 0.0).astype(o_ref.dtype)


def _round_up(x, m):
    return -(-x // m) * m


def _vmem_capacity_bytes():
    try:
        return int(pltpu.get_tpu_info().vmem_capacity_bytes)
    except Exception:
        # Conservative fallback: v7x per-TensorCore VMEM (smallest of the gens).
        return 64 << 20


def _choose_tile_rows(B, n_rows, in_isz, out_isz, vmem_budget_bytes):
    """Number of 128-lane rows per grid step (multiple of the sublane pack,
    or the full extent)."""
    # Packed sub-32-bit dtypes want sublane tiles in multiples of 16 (bf16) /
    # 32 (int8/fp8); f32 wants multiples of 8.
    sub_mult = 8 if in_isz >= 4 else (16 if in_isz == 2 else 32)

    # Double-buffered x + out blocks plus f32 gamma/beta tiles, per 128-row.
    bytes_per_row = 2 * (B * LANES * (in_isz + out_isz) + 2 * LANES * 4)
    cap = max(sub_mult,
              (vmem_budget_bytes // max(bytes_per_row, 1)) // sub_mult * sub_mult)

    if n_rows <= cap:
        ts = n_rows  # full extent -> always a legal block shape
        # Split only when the payload is large enough to amortize extra grid
        # steps (>= ~1 MB per half); tiny problems stay a single step.
        payload = B * n_rows * LANES * (in_isz + out_isz)
        if payload > (2 << 20) and n_rows >= 2 * sub_mult:
            half = _round_up(-(-n_rows // 2), sub_mult)
            if half < n_rows:
                ts = half
        return ts
    return cap


def pooling2_forward(knn_x_w, gamma, beta, *, vmem_budget_bytes=None):
    """knn_x_w: (B, C, H, W) -> (B, C*H*W); BatchNorm1d (training stats) + ReLU."""
    B = knn_x_w.shape[0]
    x2d = knn_x_w.reshape(B, -1)                 # same row-major flatten as torch
    D = x2d.shape[1]
    assert gamma.shape == (D,) and beta.shape == (D,)

    out_dtype = x2d.dtype
    in_isz = jnp.dtype(x2d.dtype).itemsize
    out_isz = jnp.dtype(out_dtype).itemsize

    # Pad the feature axis to a multiple of 128 lanes only (no-op when already
    # aligned).  Padded columns produce exact zeros and are sliced off once.
    D_pad = _round_up(D, LANES)
    if D_pad != D:
        pad = D_pad - D
        x2d = jnp.pad(x2d, ((0, 0), (0, pad)))
        gamma = jnp.pad(gamma, (0, pad))
        beta = jnp.pad(beta, (0, pad))
    n_rows = D_pad // LANES

    # Sublane+lane-dense layout (metadata-only reshapes).
    x3 = x2d.reshape(B, n_rows, LANES)
    g3 = gamma.reshape(n_rows, LANES).astype(jnp.float32)
    b3 = beta.reshape(n_rows, LANES).astype(jnp.float32)

    vmem_cap = _vmem_capacity_bytes()
    if vmem_budget_bytes is None:
        vmem_budget_bytes = vmem_cap // 2
    ts = _choose_tile_rows(B, n_rows, in_isz, out_isz, vmem_budget_bytes)
    grid = (pl.cdiv(n_rows, ts),)

    # Exact double-buffered footprint (layout is dense, no hidden (8,128) pad)
    # plus headroom, clamped well under physical VMEM.
    footprint = 2 * (B * ts * LANES * (in_isz + out_isz) + 2 * ts * LANES * 4)
    vmem_limit = int(max(16 << 20,
                         min(int(vmem_cap * 0.75), footprint + (4 << 20))))

    out3 = pl.pallas_call(
        _bn_relu_kernel,
        out_shape=jax.ShapeDtypeStruct((B, n_rows, LANES), out_dtype),
        grid_spec=pltpu.PrefetchScalarGridSpec(
            num_scalar_prefetch=0,
            grid=grid,
            in_specs=[
                pl.BlockSpec((B, ts, LANES), lambda j: (0, j, 0)),   # x slab
                pl.BlockSpec((ts, LANES), lambda j: (j, 0)),         # gamma tile
                pl.BlockSpec((ts, LANES), lambda j: (j, 0)),         # beta tile
            ],
            out_specs=pl.BlockSpec((B, ts, LANES), lambda j: (0, j, 0)),
        ),
        compiler_params=pltpu.CompilerParams(
            dimension_semantics=("parallel",),
            vmem_limit_bytes=vmem_limit,
        ),
    )(x3, g3, b3)

    out = out3.reshape(B, D_pad)
    if D_pad != D:
        out = out[:, :D]
    return out


def reference_forward(knn_x_w, gamma, beta):
    """Pure-JAX reference matching PyTorch BatchNorm1d(training) + ReLU."""
    B = knn_x_w.shape[0]
    x = knn_x_w.reshape(B, -1).astype(jnp.float32)
    mean = jnp.mean(x, axis=0, keepdims=True)
    var = jnp.mean((x - mean) ** 2, axis=0, keepdims=True)
    y = (x - mean) / jnp.sqrt(var + EPS) * gamma[None, :] + beta[None, :]
    return jnp.maximum(y, 0.0)


if __name__ == "__main__":
    # knn_x_w is (B, C, H, W); flattened feature size D = C*H*W is the
    # BatchNorm1d `out_dim`.
    B, C, H, W = 2, 4, 16, 16
    D = C * H * W  # out_dim = 1024

    key = jax.random.PRNGKey(0)
    kx, kg, kb = jax.random.split(key, 3)
    knn_x_w = jax.random.normal(kx, (B, C, H, W), dtype=jnp.float32)
    gamma = 1.0 + 0.1 * jax.random.normal(kg, (D,), dtype=jnp.float32)
    beta = 0.1 * jax.random.normal(kb, (D,), dtype=jnp.float32)

    out = jax.block_until_ready(pooling2_forward(knn_x_w, gamma, beta))
    ref = reference_forward(knn_x_w, gamma, beta)
    assert out.shape == (B, D), out.shape
    assert jnp.allclose(out, ref, atol=1e-5, rtol=1e-5), float(
        jnp.max(jnp.abs(out - ref))
    )

    # Ragged-D case (D = 500, not a multiple of 128): exercises the 128-lane
    # padding + single output slice path.
    C2, H2, W2 = 5, 10, 10
    D2 = C2 * H2 * W2
    kx2, kg2, kb2 = jax.random.split(jax.random.PRNGKey(1), 3)
    x2 = jax.random.normal(kx2, (B, C2, H2, W2), dtype=jnp.float32)
    g2 = 1.0 + 0.1 * jax.random.normal(kg2, (D2,), dtype=jnp.float32)
    b2 = 0.1 * jax.random.normal(kb2, (D2,), dtype=jnp.float32)
    out2 = jax.block_until_ready(pooling2_forward(x2, g2, b2))
    ref2 = reference_forward(x2, g2, b2)
    assert out2.shape == (B, D2), out2.shape
    assert jnp.allclose(out2, ref2, atol=1e-5, rtol=1e-5), float(
        jnp.max(jnp.abs(out2 - ref2))
    )

    # Multi-step grid with a non-dividing final block (n_rows = 36, ts forced
    # to 16 via a tiny VMEM budget): exercises the clipped-boundary path.
    C3, H3, W3 = 36, 8, 16
    D3 = C3 * H3 * W3  # 4608 = 36 * 128
    kx3, kg3, kb3 = jax.random.split(jax.random.PRNGKey(2), 3)
    x3 = jax.random.normal(kx3, (B, C3, H3, W3), dtype=jnp.float32)
    g3 = 1.0 + 0.1 * jax.random.normal(kg3, (D3,), dtype=jnp.float32)
    b3 = 0.1 * jax.random.normal(kb3, (D3,), dtype=jnp.float32)
    out3 = jax.block_until_ready(
        pooling2_forward(x3, g3, b3, vmem_budget_bytes=96 * 1024)
    )
    ref3 = reference_forward(x3, g3, b3)
    assert out3.shape == (B, D3), out3.shape
    assert jnp.allclose(out3, ref3, atol=1e-5, rtol=1e-5), float(
        jnp.max(jnp.abs(out3 - ref3))
    )

    print("KERNEL_OK")
</pallas_src>

<mosaic_0001>
module attributes {stable_mosaic.version = 11 : i64} {
  func.func @_bn_relu_kernel(%arg0: i32, %arg1: memref<2x8x128xf32, #tpu.memory_space<vmem>>, %arg2: memref<8x128xf32, #tpu.memory_space<vmem>>, %arg3: memref<8x128xf32, #tpu.memory_space<vmem>>, %arg4: memref<2x8x128xf32, #tpu.memory_space<vmem>>) attributes {dimension_semantics = [#tpu.dimension_semantics<parallel>], iteration_bounds = array<i64: 1>, scalar_prefetch = 0 : i64, scratch_operands = 0 : i64, tpu.core_type = #tpu.core_type<tc>, window_params = [{transform_indices = @transform_0, window_bounds = array<i64: 2, 8, 128>}, {transform_indices = @transform_1, window_bounds = array<i64: 8, 128>}, {transform_indices = @transform_2, window_bounds = array<i64: 8, 128>}, {transform_indices = @transform_3, window_bounds = array<i64: 2, 8, 128>}]} {
    %c0 = arith.constant 0 : index
    %c0_0 = arith.constant 0 : index
    %c0_1 = arith.constant 0 : index
    %0 = vector.load %arg1[%c0, %c0_0, %c0_1] : memref<2x8x128xf32, #tpu.memory_space<vmem>>, vector<2x8x128xf32>
    %cst = arith.constant dense<0.000000e+00> : vector<8x128xf32>
    %1 = vector.multi_reduction <add>, %0, %cst [0] : vector<2x8x128xf32> to vector<8x128xf32>
    %2 = vector.shape_cast %1 : vector<8x128xf32> to vector<1x8x128xf32>
    %cst_2 = arith.constant 5.000000e-01 : f32
    %3 = vector.broadcast %cst_2 : f32 to vector<1x8x128xf32>
    %4 = arith.mulf %2, %3 : vector<1x8x128xf32>
    %5 = vector.broadcast %4 : vector<1x8x128xf32> to vector<2x8x128xf32>
    %6 = arith.subf %0, %5 : vector<2x8x128xf32>
    %7 = arith.mulf %6, %6 : vector<2x8x128xf32>
    %cst_3 = arith.constant dense<0.000000e+00> : vector<8x128xf32>
    %8 = vector.multi_reduction <add>, %7, %cst_3 [0] : vector<2x8x128xf32> to vector<8x128xf32>
    %9 = vector.shape_cast %8 : vector<8x128xf32> to vector<1x8x128xf32>
    %cst_4 = arith.constant 5.000000e-01 : f32
    %10 = vector.broadcast %cst_4 : f32 to vector<1x8x128xf32>
    %11 = arith.mulf %9, %10 : vector<1x8x128xf32>
    %cst_5 = arith.constant 9.99999974E-6 : f32
    %12 = vector.broadcast %cst_5 : f32 to vector<1x8x128xf32>
    %13 = arith.addf %11, %12 : vector<1x8x128xf32>
    %14 = math.rsqrt %13 : vector<1x8x128xf32>
    %c0_6 = arith.constant 0 : index
    %c0_7 = arith.constant 0 : index
    %15 = vector.load %arg2[%c0_6, %c0_7] : memref<8x128xf32, #tpu.memory_space<vmem>>, vector<8x128xf32>
    %16 = vector.shape_cast %15 : vector<8x128xf32> to vector<1x8x128xf32>
    %c0_8 = arith.constant 0 : index
    %c0_9 = arith.constant 0 : index
    %17 = vector.load %arg3[%c0_8, %c0_9] : memref<8x128xf32, #tpu.memory_space<vmem>>, vector<8x128xf32>
    %18 = vector.shape_cast %17 : vector<8x128xf32> to vector<1x8x128xf32>
    %19 = arith.mulf %14, %16 : vector<1x8x128xf32>
    %20 = vector.broadcast %19 : vector<1x8x128xf32> to vector<2x8x128xf32>
    %21 = arith.mulf %6, %20 : vector<2x8x128xf32>
    %22 = vector.broadcast %18 : vector<1x8x128xf32> to vector<2x8x128xf32>
    %23 = arith.addf %21, %22 : vector<2x8x128xf32>
    %cst_10 = arith.constant 0.000000e+00 : f32
    %24 = vector.broadcast %cst_10 : f32 to vector<2x8x128xf32>
    %25 = arith.maximumf %23, %24 : vector<2x8x128xf32>
    %c0_11 = arith.constant 0 : index
    %c0_12 = arith.constant 0 : index
    %c0_13 = arith.constant 0 : index
    %26 = vector.load %arg4[%c0_11, %c0_12, %c0_13] : memref<2x8x128xf32, #tpu.memory_space<vmem>>, vector<2x8x128xf32>
    tpu.vector_store %arg4[%c0_11, %c0_12, %c0_13], %25 {strides = array<i32>} : memref<2x8x128xf32, #tpu.memory_space<vmem>>, vector<2x8x128xf32>,
    return
  }
  func.func @transform_0(%arg0: i32) -> (i32, i32, i32) {
    %c0_i32 = arith.constant 0 : i32
    %c0_i32_0 = arith.constant 0 : i32
    %c0_i32_1 = arith.constant 0 : i32
    return %c0_i32, %arg0, %c0_i32_0 : i32, i32, i32
  }
  func.func @transform_1(%arg0: i32) -> (i32, i32) {
    %c0_i32 = arith.constant 0 : i32
    %c0_i32_0 = arith.constant 0 : i32
    return %arg0, %c0_i32 : i32, i32
  }
  func.func @transform_2(%arg0: i32) -> (i32, i32) {
    %c0_i32 = arith.constant 0 : i32
    %c0_i32_0 = arith.constant 0 : i32
    return %arg0, %c0_i32 : i32, i32
  }
  func.func @transform_3(%arg0: i32) -> (i32, i32, i32) {
    %c0_i32 = arith.constant 0 : i32
    %c0_i32_0 = arith.constant 0 : i32
    %c0_i32_1 = arith.constant 0 : i32
    return %c0_i32, %arg0, %c0_i32_0 : i32, i32, i32
  }
}

</mosaic_0001>

<bundles_post_ra>
// kernel: tpu_custom_call.1
= control target key start
LH: loop header
LB: loop body
LE: loop exit
PB: predicated region body
PF: predicated region fallthrough
CT: control target
= control target key end

     0   :  { %8 = vsyncpa [#allocation3], 0  ;;  %s282_s0 = inlined_call_operand.hbm [shape: f32[2,8,128], index: 0, kind: input, shape index: {}]   ;;  %s283_s1 = inlined_call_operand.hbm [shape: f32[8,128], index: 1, kind: input, shape index: {}]   ;;  %s284_s2 = inlined_call_operand.hbm [shape: f32[8,128], index: 2, kind: input, shape index: {}]   ;;  %s285_s3 = inlined_call_operand.hbm [shape: f32[2,8,128], index: 3, kind: output, shape index: {}]  }
   0x1   :  { %9 = vsyncpa [#allocation6], 0 }
   0x2   :  { %10 = vsyncpa [#allocation4], 0  ;;  %s195_s12 = smov [#allocation5]   ;;  %s196_s14 = smov [#allocation2]  }
   0x3   :  { %s29_s13 = sshll.u32 %s195_s12, 4  ;;  %s16_s15 = sshll.u32 %s196_s14, 4  ;;  %s30_s13 = int_to_ptr.vmem [resolvable:$true] %s29_s13  ;;  %s221_s15 = int_to_ptr.vmem [resolvable:$true] %s16_s15 }
   0x4   :  { %s101_s18 = scalar_lea.hbm %s283_s1, 128 }
   0x5   :  { %p102_p0 = scmp.ne.s32.totalorder %s283_s1, %s101_s18  ;;  %p105_p1 = scmp.lt.u32.totalorder %s101_s18, %s283_s1 }
   0x7   :  { %p107_p2 = pnand %p105_p1, %p102_p0 }
   0x9   :  { %110 = shalt.err (!%p107_p2)
}
   0xa   :  { %s111_s23 = scalar_lea.vmem %s30_s13, 128  ;;  %p116_p4 = scmp.lt.s32.totalorder %s30_s13, %s30_s13 }
   0xb   :  { %p112_p3 = scmp.ne.s32.totalorder %s30_s13, %s111_s23  ;;  %p117_p5 = scmp.lt.s32.totalorder %s111_s23, %s111_s23 }
   0xd   :  { %p118_p6 = por %p117_p5, %p116_p4 }
   0xf   :  { %p119_p7 = pnand %p118_p6, %p112_p3 }
  0x11   :  { %122 = shalt.err (!%p119_p7)
}
  0x12   :  { %32 = dma.hbm_to_vmem [thread:$0]  %s283_s1, 128, %s30_s13, [#allocation6]  }
  0x13   :  { %s123_s28 = scalar_lea.hbm %s282_s0, 256 }
  0x14   :  { %p124_p8 = scmp.ne.s32.totalorder %s282_s0, %s123_s28  ;;  %p127_p9 = scmp.lt.u32.totalorder %s123_s28, %s282_s0 }
  0x16   :  { %p129_p10 = pnand %p127_p9, %p124_p8 }
  0x18   :  { %132 = shalt.err (!%p129_p10)
}
  0x19   :  { %s133_s6 = scalar_lea.vmem %s221_s15, 256  ;;  %p138_p12 = scmp.lt.s32.totalorder %s221_s15, %s221_s15 }
  0x1a   :  { %p134_p11 = scmp.ne.s32.totalorder %s221_s15, %s133_s6  ;;  %p139_p13 = scmp.lt.s32.totalorder %s133_s6, %s133_s6 }
  0x1c   :  { %p140_p0 = por %p139_p13, %p138_p12 }
  0x1e   :  { %p141_p1 = pnand %p140_p0, %p134_p11 }
  0x20   :  { %144 = shalt.err (!%p141_p1)
}
  0x21   :  { %s197_s1 = smov 128   ;;  %s198_s7 = smov 8  }
  0x22   :  { %22 = dma.hbm_to_vmem [thread:$0]  %s282_s0, 256, %s221_s15, [#allocation3], %s197_s1, %s197_s1, %s198_s7  }
  0x23   :  { %s199_s10 = smov [#allocation7]   ;;  %s145_s14 = scalar_lea.hbm %s284_s2, 128 }
  0x24   :  { %s39_s11 = sshll.u32 %s199_s10, 4  ;;  %p146_p2 = scmp.ne.s32.totalorder %s284_s2, %s145_s14  ;;  %s40_s11 = int_to_ptr.vmem [resolvable:$true] %s39_s11 }
  0x25   :  { %p149_p3 = scmp.lt.u32.totalorder %s145_s14, %s284_s2 }
  0x27   :  { %p151_p4 = pnand %p149_p3, %p146_p2 }
  0x29   :  { %154 = shalt.err (!%p151_p4)
}
  0x2a   :  { %s155_s20 = scalar_lea.vmem %s40_s11, 128  ;;  %p160_p6 = scmp.lt.s32.totalorder %s40_s11, %s40_s11 }
  0x2b   :  { %p156_p5 = scmp.ne.s32.totalorder %s40_s11, %s155_s20  ;;  %p161_p7 = scmp.lt.s32.totalorder %s155_s20, %s155_s20 }
  0x2d   :  { %p162_p8 = por %p161_p7, %p160_p6 }
  0x2f   :  { %p163_p9 = pnand %p162_p8, %p156_p5 }
  0x31   :  { %166 = shalt.err (!%p163_p9)
}
  0x32   :  { %42 = dma.hbm_to_vmem [thread:$0]  %s284_s2, 128, %s40_s11, [#allocation6]  }
  0x33   :  { %189 = dma.done.wait [#allocation3], 256  }
  0x34   :  { %190 = vsyncadd [#allocation3], 4294967040 }
  0x35   :  { %191 = dma.done.wait [#allocation6], 256  }
  0x36   :  { %192 = vsyncadd [#allocation6], 4294967040  ;;  %v52_v0 = vld [vmem:[#allocation2] sm:$0xff]  ;;  %v53_v1 = vld [vmem:[#allocation2 + $0x8] sm:$0xff]  ;;  %s200_s2 = smov [#allocation8]  }
  0x37   :  { %v54_v2 = vadd.f32 %v53_v1, %v52_v0  ;;  %v64_v11 = vld [vmem:[#allocation5] sm:$0xff]  ;;  %v65_v14 = vld [vmem:[#allocation7] sm:$0xff]  ;;  %s80_s21 = sshll.u32 %s200_s2, 4  ;;  %s81_s21 = int_to_ptr.vmem [resolvable:$true] %s80_s21 }
  0x38   :  { %s167_s22 = scalar_lea.vmem %s81_s21, 256  ;;  %p172_p11 = scmp.lt.s32.totalorder %s81_s21, %s81_s21 }
  0x39   :  { %v55_v3 = vmul.f32 0.5, %v54_v2  ;;  %p168_p10 = scmp.ne.s32.totalorder %s81_s21, %s167_s22  ;;  %p173_p12 = scmp.lt.s32.totalorder %s167_s22, %s167_s22 }
  0x3b   :  { %v56_v4 = vsub.f32 %v52_v0, %v55_v3  ;;  %v57_v5 = vsub.f32 %v53_v1, %v55_v3  ;;  %p174_p13 = por %p173_p12, %p172_p11 }
  0x3d   :  { %v58_v6 = vmul.f32 %v56_v4, %v56_v4  ;;  %v59_v7 = vmul.f32 %v57_v5, %v57_v5  ;;  %p175_p0 = pnand %p174_p13, %p168_p10 }
  0x3f   :  { %v60_v8 = vadd.f32 %v59_v7, %v58_v6 }
  0x41   :  { %v61_v9 = vmul.f32 0.5, %v60_v8 }
  0x43   :  { %v62_v10 = vadd.f32 1e-05, %v61_v9 }
  0x45   :  { %99 = vrsqrt.f32 %v62_v10 }
  0x4f   :  { %v100_v12 = vpop.eup %99 }
  0x50   :  { %v66_v13 = vmul.f32 %v100_v12, %v64_v11 }
  0x52   :  { %v67_v15 = vmul.f32 %v66_v13, %v56_v4  ;;  %v68_v16 = vmul.f32 %v66_v13, %v57_v5 }
  0x54   :  { %v69_v17 = vadd.f32 %v67_v15, %v65_v14  ;;  %v70_v18 = vadd.f32 %v68_v16, %v65_v14 }
  0x56   :  { %v71_v19 = vmax.f32 %v69_v17, 0.0  ;;  %v72_v20 = vmax.f32 %v70_v18, 0.0 }
  0x58   :  { %73 = vst [vmem:[#allocation8] sm:$0xff] %v71_v19  ;;  %74 = vst [vmem:[#allocation8 + $0x8] sm:$0xff] %v72_v20 }
  0x59   :  { %178 = shalt.err (!%p175_p0)
}
  0x5a   :  { %s179_s25 = scalar_lea.hbm %s285_s3, 256 }
  0x5b   :  { %p180_p1 = scmp.ne.s32.totalorder %s285_s3, %s179_s25  ;;  %p183_p2 = scmp.lt.u32.totalorder %s179_s25, %s285_s3 }
  0x5d   :  { %p185_p3 = pnand %p183_p2, %p180_p1 }
  0x5f   :  { %188 = shalt.err (!%p185_p3)
}
  0x60   :  { %86 = dma.vmem_to_hbm [thread:$0]  %s81_s21, 256, %s285_s3, [#allocation4], %s197_s1, %s197_s1, %s198_s7  }
  0x61   :  { %193 = dma.done.wait [#allocation4], 256  }
  0x62   :  { %194 = vsyncadd [#allocation4], 4294967040 }
  0x63   :  { %90 = vsyncpa [#allocation3], 1 }
  0x64   :  { %91 = vsyncpa [#allocation6], 1 }
  0x65   :  { %92 = vsyncpa [#allocation4], 1 }

</bundles_post_ra>
